<compile_context>
chip_gen: v5e
topology: v5e:2x2
jax: 0.10.0
libtpu: 0.0.40
codegen_flags: <defaults>
</compile_context>

<pallas_src>
import jax
import jax.numpy as jnp
from jax.experimental import pallas as pl
from jax.experimental.pallas import tpu as pltpu


def _round_up(x, m):
    return ((x + m - 1) // m) * m


def _vmem_budget_bytes():
    """~75% of per-core VMEM; conservative 64 MiB fallback (v7x-safe)."""
    cap = 64 << 20
    try:
        info = pltpu.get_tpu_info()
        cap = int(getattr(info, "vmem_capacity_bytes", cap))
    except Exception:
        pass
    return int(cap * 0.75)


def _fit(x, rows, cols, dtype):
    """Pad-with-zeros / trim / cast so x has shape (rows, cols) and dtype.
    No-op (no XLA ops traced) when x already matches."""
    r, c = x.shape
    if r > rows:
        x = x[:rows, :]
        r = rows
    if c > cols:
        x = x[:, :cols]
        c = cols
    if r != rows or c != cols:
        x = jnp.pad(x, ((0, rows - r), (0, cols - c)))
    if x.dtype != dtype:
        x = x.astype(dtype)
    return x


def _plan_nodes(n_dst, n_src, tile_m, tile_k):
    """Effective tiles + padded node counts (idempotent on padded shapes)."""
    tile_m_eff = min(tile_m, _round_up(n_dst, 8))
    n_dst_p = _round_up(n_dst, tile_m_eff)
    # Keep >= 2 blocks on the parallel dst-row axis when possible so v7x's two
    # TensorCores both get work (harmless on single-TC v5e/v6e).
    if n_dst_p // tile_m_eff == 1 and n_dst_p >= 16 and n_dst_p % 16 == 0:
        tile_m_eff = n_dst_p // 2
    tile_k_eff = min(tile_k, _round_up(n_src, 128))
    n_src_p = _round_up(n_src, tile_k_eff)
    return tile_m_eff, n_dst_p, tile_k_eff, n_src_p


def _choose_din_tile(d_in_p, tile_k, d_out_p, itemsize, budget):
    """Largest multiple-of-128 divisor of d_in_p whose XW-kernel footprint fits
    the VMEM budget (guards large feature dims on v7x's 64 MiB VMEM)."""
    fixed = 2 * tile_k * d_out_p * itemsize + tile_k * d_out_p * 4
    per_din = 2 * itemsize * (tile_k + d_out_p)
    cap = max(budget - fixed, 128 * per_din) // per_din
    cap = max(128, (cap // 128) * 128)
    if d_in_p <= cap:
        return d_in_p
    best, t = 128, 128
    while t <= cap:
        if d_in_p % t == 0:
            best = t
        t += 128
    return best


# ---------------------------------------------------------------------------
# Kernel 1: feature transform  XW = X @ W
#   grid = (src row tiles [parallel], d_in tiles [arbitrary]); f32 accumulator.
# ---------------------------------------------------------------------------
def _xw_kernel(x_ref, w_ref, o_ref, acc_ref):
    j = pl.program_id(1)

    @pl.when(j == 0)
    def _():
        acc_ref[...] = jnp.zeros_like(acc_ref)

    acc_ref[...] += jnp.dot(
        x_ref[...], w_ref[...], preferred_element_type=jnp.float32
    )

    @pl.when(j == pl.num_programs(1) - 1)
    def _():
        o_ref[...] = acc_ref[...].astype(o_ref.dtype)


# ---------------------------------------------------------------------------
# Kernel 2: aggregation  Z = relu(A_hat @ XW + b)
#   grid = (dst row tiles [parallel], src K tiles [arbitrary])
#   f32 accumulator scratch; bias + ReLU only on the final K step.
#   When XW is VMEM-resident, the k-tile is sliced in-kernel with pl.ds.
# ---------------------------------------------------------------------------
def _make_agg_kernel(xw_resident, tile_k):
    def kernel(a_ref, xw_ref, b_ref, o_ref, acc_ref):
        k = pl.program_id(1)

        @pl.when(k == 0)
        def _():
            acc_ref[...] = jnp.zeros_like(acc_ref)

        if xw_resident:
            start = pl.multiple_of(k * tile_k, tile_k)
            xw_blk = xw_ref[pl.ds(start, tile_k), :]
        else:
            xw_blk = xw_ref[...]

        acc_ref[...] += jnp.dot(
            a_ref[...], xw_blk, preferred_element_type=jnp.float32
        )

        @pl.when(k == pl.num_programs(1) - 1)
        def _():
            o_ref[...] = jnp.maximum(acc_ref[...] + b_ref[...], 0.0).astype(
                o_ref.dtype)

    return kernel


def prepare_adjacencies(adjs, *, tile_m=512, tile_k=512,
                        compute_dtype=jnp.bfloat16):
    """Pad + cast normalized adjacencies once (hoist to graph construction when
    the same graph is reused across forwards)."""
    prepped = []
    for a in adjs:
        n_dst, n_src = a.shape
        _, n_dst_p, _, n_src_p = _plan_nodes(n_dst, n_src, tile_m, tile_k)
        prepped.append(_fit(a, n_dst_p, n_src_p, compute_dtype))
    return prepped


def gconv_layer(a_hat, x, w, b, *, tile_m=512, tile_k=512,
                compute_dtype=jnp.bfloat16, xw_resident=None):
    """One GraphConv + ReLU layer: relu(a_hat @ (x @ w) + b).

    a_hat: [n_dst, n_src] dense normalized adjacency (may be pre-padded).
    x:     [n_src, d_in]  source-node features (may be pre-padded).
    w:     [d_in, d_out], b: [d_out].
    Returns the PADDED output [n_dst_p, d_out_p] in compute_dtype (padded dst
    rows hold relu(b); they are zeroed out by the next layer's zero A columns
    and sliced off by gconv_forward at the end).
    """
    assert tile_m % 8 == 0 and tile_k % 128 == 0
    n_dst, n_src = a_hat.shape
    d_in, d_out = w.shape

    tile_m_eff, n_dst_p, tile_k_eff, n_src_p = _plan_nodes(
        n_dst, n_src, tile_m, tile_k)
    d_in_p = _round_up(d_in, 128)
    d_out_p = _round_up(d_out, 128)

    itemsize = jnp.dtype(compute_dtype).itemsize
    budget = _vmem_budget_bytes()

    # --- pad / cast (no-ops when inputs are already prepared / chained) ------
    a_p = _fit(a_hat, n_dst_p, n_src_p, compute_dtype)
    x_p = _fit(x, n_src_p, d_in_p, compute_dtype)
    w_p = _fit(w, d_in_p, d_out_p, compute_dtype)
    b_p = _fit(b.reshape(1, d_out), 1, d_out_p, jnp.float32)

    # ---- XW = X @ W (computed once per layer, d_in K-tiled) -----------------
    tile_din = _choose_din_tile(d_in_p, tile_k_eff, d_out_p, itemsize, budget)
    xw_bytes = (2 * tile_k_eff * tile_din * itemsize
                + 2 * tile_din * d_out_p * itemsize
                + 2 * tile_k_eff * d_out_p * itemsize
                + tile_k_eff * d_out_p * 4)
    vmem_limit_xw = int(min(max(int(1.5 * xw_bytes), 32 << 20), budget))

    xw = pl.pallas_call(
        _xw_kernel,
        out_shape=jax.ShapeDtypeStruct((n_src_p, d_out_p), compute_dtype),
        grid_spec=pltpu.PrefetchScalarGridSpec(
            num_scalar_prefetch=0,
            grid=(n_src_p // tile_k_eff, d_in_p // tile_din),
            in_specs=[
                pl.BlockSpec((tile_k_eff, tile_din), lambda i, j: (i, j)),
                pl.BlockSpec((tile_din, d_out_p), lambda i, j: (j, 0)),
            ],
            out_specs=pl.BlockSpec((tile_k_eff, d_out_p), lambda i, j: (i, 0)),
            scratch_shapes=[pltpu.VMEM((tile_k_eff, d_out_p), jnp.float32)],
        ),
        compiler_params=pltpu.CompilerParams(
            dimension_semantics=("parallel", "arbitrary"),
            vmem_limit_bytes=vmem_limit_xw,
        ),
    )(x_p, w_p)

    # ---- Z = relu(A_hat @ XW + b) --------------------------------------------
    base_bytes = (2 * tile_m_eff * tile_k_eff * itemsize     # A tiles (dbl-buf)
                  + 2 * tile_m_eff * d_out_p * itemsize      # output tiles
                  + tile_m_eff * d_out_p * 4                 # f32 acc scratch
                  + 2 * 8 * d_out_p * 4)                     # bias
    resident_bytes = base_bytes + 2 * n_src_p * d_out_p * itemsize
    tiled_bytes = base_bytes + 2 * tile_k_eff * d_out_p * itemsize

    if xw_resident is None:
        # keep the resident-XW slab well inside even v7x's 64 MiB per-TC VMEM
        xw_resident = resident_bytes <= int(0.6 * budget)

    agg_bytes = resident_bytes if xw_resident else tiled_bytes
    vmem_limit = int(min(max(int(1.5 * agg_bytes), 32 << 20), budget))

    if xw_resident:
        xw_spec = pl.BlockSpec((n_src_p, d_out_p), lambda i, k: (0, 0))
    else:
        xw_spec = pl.BlockSpec((tile_k_eff, d_out_p), lambda i, k: (k, 0))

    out = pl.pallas_call(
        _make_agg_kernel(xw_resident, tile_k_eff),
        out_shape=jax.ShapeDtypeStruct((n_dst_p, d_out_p), compute_dtype),
        grid_spec=pltpu.PrefetchScalarGridSpec(
            num_scalar_prefetch=0,
            grid=(n_dst_p // tile_m_eff, n_src_p // tile_k_eff),
            in_specs=[
                pl.BlockSpec((tile_m_eff, tile_k_eff), lambda i, k: (i, k)),
                xw_spec,
                pl.BlockSpec((1, d_out_p), lambda i, k: (0, 0)),
            ],
            out_specs=pl.BlockSpec((tile_m_eff, d_out_p), lambda i, k: (i, 0)),
            scratch_shapes=[pltpu.VMEM((tile_m_eff, d_out_p), jnp.float32)],
        ),
        compiler_params=pltpu.CompilerParams(
            dimension_semantics=("parallel", "arbitrary"),
            vmem_limit_bytes=vmem_limit,
        ),
    )(a_p, xw, b_p)

    return out  # padded, compute_dtype


def gconv_forward(adjs, feats, weights, biases, *, tile_m=512, tile_k=512,
                  compute_dtype=jnp.bfloat16, xw_resident=None, n_out=None):
    """Stack of GraphConv+ReLU layers (GConv.forward). adjs[i] is the dense
    normalized block adjacency for layer i (raw or from prepare_adjacencies);
    feats is blocks[0].srcdata['feat'].  Pass n_out (dst node count of the
    last block) when using pre-padded adjacencies."""
    z = feats
    for a_hat, w, b in zip(adjs, weights, biases):
        z = gconv_layer(a_hat, z, w, b, tile_m=tile_m, tile_k=tile_k,
                        compute_dtype=compute_dtype, xw_resident=xw_resident)
    n_last = adjs[-1].shape[0] if n_out is None else n_out
    d_last = weights[-1].shape[1]
    return z[:n_last, :d_last]


def normalized_adjacency(key, n_dst, n_src):
    """Random bipartite block adjacency with a self-loop-like diagonal and
    DGL norm='both' normalization (D_dst^{-1/2} A D_src^{-1/2})."""
    a = (jax.random.uniform(key, (n_dst, n_src)) < 0.3).astype(jnp.float32)
    eye = jnp.eye(n_dst, n_src, dtype=jnp.float32)
    a = jnp.clip(a + eye, 0.0, 1.0)
    deg_dst = jnp.clip(a.sum(axis=1, keepdims=True), 1.0, None)
    deg_src = jnp.clip(a.sum(axis=0, keepdims=True), 1.0, None)
    return a * (deg_dst ** -0.5) * (deg_src ** -0.5)


def _ref_forward(adjs, feats, weights, biases, compute_dtype):
    """Plain-JAX reference with the same casting points as the kernels."""
    z = feats.astype(compute_dtype)
    for a, w, b in zip(adjs, weights, biases):
        xw = jnp.dot(z.astype(compute_dtype), w.astype(compute_dtype),
                     preferred_element_type=jnp.float32).astype(compute_dtype)
        z = jnp.maximum(
            jnp.dot(a.astype(compute_dtype), xw,
                    preferred_element_type=jnp.float32) + b[None, :], 0.0)
        z = z.astype(compute_dtype)
    return z.astype(jnp.float32)


if __name__ == "__main__":
    key = jax.random.PRNGKey(0)
    num_layers = 2
    n_nodes = 256          # same src/dst node count per block for simplicity
    input_dim = 64         # padded to 128 inside the kernel wrapper
    hidden_dim = 96        # padded to 128 inside the kernel wrapper

    keys = jax.random.split(key, 2 + 2 * num_layers)
    feats = jax.random.normal(keys[0], (n_nodes, input_dim), dtype=jnp.float32)

    dims = [input_dim] + [hidden_dim] * num_layers
    weights, biases, adjs = [], [], []
    for i in range(num_layers):
        d_in, d_out = dims[i], dims[i + 1]
        scale = (6.0 / (d_in + d_out)) ** 0.5
        w = jax.random.uniform(keys[1 + i], (d_in, d_out),
                               minval=-scale, maxval=scale, dtype=jnp.float32)
        weights.append(w)
        biases.append(jnp.full((d_out,), 0.01, dtype=jnp.float32))
        adjs.append(normalized_adjacency(keys[1 + num_layers + i],
                                         n_nodes, n_nodes))

    # ---- Run 1: default bf16 path, adjacencies pre-padded/cast once, ---------
    #      resident-XW auto-gated (small graph -> resident), grid (2,1)/layer.
    adjs_bf16 = prepare_adjacencies(adjs, tile_m=512, tile_k=512,
                                    compute_dtype=jnp.bfloat16)
    out_bf16 = gconv_forward(adjs_bf16, feats, weights, biases,
                             tile_m=512, tile_k=512,
                             compute_dtype=jnp.bfloat16, n_out=n_nodes)
    out_bf16 = jax.block_until_ready(out_bf16)
    ref_bf16 = _ref_forward(adjs, feats, weights, biases, jnp.bfloat16)
    assert out_bf16.shape == (n_nodes, hidden_dim)
    assert jnp.allclose(out_bf16.astype(jnp.float32), ref_bf16,
                        atol=1e-2, rtol=1e-2)

    # ---- Run 2: f32 path with small tiles and the K-tiled (non-resident) -----
    #      XW stream, so the multi-tile accumulator path is exercised too.
    out_f32 = gconv_forward(adjs, feats, weights, biases,
                            tile_m=128, tile_k=128,
                            compute_dtype=jnp.float32, xw_resident=False)
    out_f32 = jax.block_until_ready(out_f32)
    ref_f32 = _ref_forward(adjs, feats, weights, biases, jnp.float32)
    assert out_f32.shape == (n_nodes, hidden_dim)
    assert jnp.allclose(out_f32, ref_f32, atol=1e-4, rtol=1e-4)

    print("KERNEL_OK")
</pallas_src>

<mosaic_0001>
module attributes {stable_mosaic.version = 11 : i64} {
  func.func @_xw_kernel(%arg0: i32, %arg1: i32, %arg2: memref<256x128xbf16, #tpu.memory_space<vmem>>, %arg3: memref<128x128xbf16, #tpu.memory_space<vmem>>, %arg4: memref<256x128xbf16, #tpu.memory_space<vmem>>, %arg5: memref<256x128xf32, #tpu.memory_space<vmem>>) attributes {dimension_semantics = [#tpu.dimension_semantics<parallel>, #tpu.dimension_semantics<arbitrary>], iteration_bounds = array<i64: 1, 1>, scalar_prefetch = 0 : i64, scratch_operands = 1 : i64, tpu.core_type = #tpu.core_type<tc>, window_params = [{transform_indices = @transform_0, window_bounds = array<i64: 256, 128>}, {transform_indices = @transform_1, window_bounds = array<i64: 128, 128>}, {transform_indices = @transform_2, window_bounds = array<i64: 256, 128>}]} {
    %c0_i32 = arith.constant 0 : i32
    %0 = arith.cmpi eq, %arg1, %c0_i32 : i32
    %1 = arith.extui %0 : i1 to i32
    %c0_i32_0 = arith.constant 0 : i32
    %2 = arith.cmpi ne, %1, %c0_i32_0 : i32
    scf.if %2 {
      %cst_10 = arith.constant 0.000000e+00 : f32
      %12 = vector.broadcast %cst_10 : f32 to vector<256x128xf32>
      %c0_11 = arith.constant 0 : index
      %c0_12 = arith.constant 0 : index
      %13 = vector.load %arg5[%c0_11, %c0_12] : memref<256x128xf32, #tpu.memory_space<vmem>>, vector<256x128xf32>
      tpu.vector_store %arg5[%c0_11, %c0_12], %12 {strides = array<i32>} : memref<256x128xf32, #tpu.memory_space<vmem>>, vector<256x128xf32>,
    } else {
    }
    %c0 = arith.constant 0 : index
    %c0_1 = arith.constant 0 : index
    %3 = vector.load %arg5[%c0, %c0_1] : memref<256x128xf32, #tpu.memory_space<vmem>>, vector<256x128xf32>
    %c0_2 = arith.constant 0 : index
    %c0_3 = arith.constant 0 : index
    %4 = vector.load %arg2[%c0_2, %c0_3] : memref<256x128xbf16, #tpu.memory_space<vmem>>, vector<256x128xbf16>
    %c0_4 = arith.constant 0 : index
    %c0_5 = arith.constant 0 : index
    %5 = vector.load %arg3[%c0_4, %c0_5] : memref<128x128xbf16, #tpu.memory_space<vmem>>, vector<128x128xbf16>
    %cst = arith.constant dense<0.000000e+00> : vector<256x128xf32>
    %6 = tpu.matmul %4, %5, %cst {dimension_numbers = #tpu.dot_dimension_numbers<[1], [0], [0], [1], [0, 0, 1, 1], [], []>} : vector<256x128xbf16>, vector<128x128xbf16>, vector<256x128xf32> -> vector<256x128xf32>
    %7 = arith.addf %3, %6 : vector<256x128xf32>
    %c0_6 = arith.constant 0 : index
    %c0_7 = arith.constant 0 : index
    %8 = vector.load %arg5[%c0_6, %c0_7] : memref<256x128xf32, #tpu.memory_space<vmem>>, vector<256x128xf32>
    tpu.vector_store %arg5[%c0_6, %c0_7], %7 {strides = array<i32>} : memref<256x128xf32, #tpu.memory_space<vmem>>, vector<256x128xf32>,
    %c0_i32_8 = arith.constant 0 : i32
    %9 = arith.cmpi eq, %arg1, %c0_i32_8 : i32
    %10 = arith.extui %9 : i1 to i32
    %c0_i32_9 = arith.constant 0 : i32
    %11 = arith.cmpi ne, %10, %c0_i32_9 : i32
    scf.if %11 {
      %c0_10 = arith.constant 0 : index
      %c0_11 = arith.constant 0 : index
      %12 = vector.load %arg5[%c0_10, %c0_11] : memref<256x128xf32, #tpu.memory_space<vmem>>, vector<256x128xf32>
      %13 = arith.truncf %12 : vector<256x128xf32> to vector<256x128xbf16>
      %c0_12 = arith.constant 0 : index
      %c0_13 = arith.constant 0 : index
      %14 = vector.load %arg4[%c0_12, %c0_13] : memref<256x128xbf16, #tpu.memory_space<vmem>>, vector<256x128xbf16>
      tpu.vector_store %arg4[%c0_12, %c0_13], %13 {strides = array<i32>} : memref<256x128xbf16, #tpu.memory_space<vmem>>, vector<256x128xbf16>,
    } else {
    }
    return
  }
  func.func @transform_0(%arg0: i32, %arg1: i32) -> (i32, i32) {
    %c0_i32 = arith.constant 0 : i32
    return %arg0, %arg1 : i32, i32
  }
  func.func @transform_1(%arg0: i32, %arg1: i32) -> (i32, i32) {
    %c0_i32 = arith.constant 0 : i32
    %c0_i32_0 = arith.constant 0 : i32
    return %arg1, %c0_i32 : i32, i32
  }
  func.func @transform_2(%arg0: i32, %arg1: i32) -> (i32, i32) {
    %c0_i32 = arith.constant 0 : i32
    %c0_i32_0 = arith.constant 0 : i32
    return %arg0, %c0_i32 : i32, i32
  }
}

</mosaic_0001>

<bundles_post_ra>
// kernel: tpu_custom_call.1
= control target key start
LH: loop header
LB: loop body
LE: loop exit
PB: predicated region body
PF: predicated region fallthrough
CT: control target
= control target key end

     0   :  { %7 = vsyncpa [#allocation4], 0  ;;  %s936_s0 = inlined_call_operand.hbm [shape: bf16[256,128], index: 0, kind: input, shape index: {}]   ;;  %s937_s1 = inlined_call_operand.hbm [shape: bf16[128,128], index: 1, kind: input, shape index: {}]   ;;  %s938_s2 = inlined_call_operand.hbm [shape: bf16[256,128], index: 2, kind: output, shape index: {}]  }
   0x1   :  { %8 = vsyncpa [#allocation7], 0 }
   0x2   :  { %9 = vsyncpa [#allocation5], 0  ;;  %s14_s11 = sshll.u32 %s936_s0, 4  ;;  %s898_s12 = smov [#allocation3]   ;;  %s15_s11 = int_to_ptr.hbm [resolvable:$true] %s14_s11 }
   0x3   :  { %s16_s13 = sshll.u32 %s898_s12, 4  ;;  %s27_s16 = sshll.u32 %s937_s1, 4  ;;  %s17_s13 = int_to_ptr.vmem [resolvable:$true] %s16_s13  ;;  %s28_s16 = int_to_ptr.hbm [resolvable:$true] %s27_s16 }
   0x4   :  { %s899_s17 = smov 64   ;;  %s900_s18 = smov 4  }
   0x5   :  { %22 = dma.hbm_to_vmem [thread:$0]  %s15_s11, 2048, %s17_s13, [#allocation4], %s899_s17, %s899_s17, %s900_s18  }
   0x6   :  { %s901_s19 = smov [#allocation6]  }
   0x7   :  { %s29_s20 = sshll.u32 %s901_s19, 4  ;;  %s30_s20 = int_to_ptr.vmem [resolvable:$true] %s29_s20 }
   0x8   :  { %35 = dma.hbm_to_vmem [thread:$0]  %s28_s16, 1024, %s30_s20, [#allocation7], %s899_s17, %s899_s17, %s900_s18  }
   0x9   :  { %892 = dma.done.wait [#allocation4], 2048  }
   0xa   :  { %893 = vsyncadd [#allocation4], 4294965248 }
   0xb   :  { %894 = dma.done.wait [#allocation7], 1024  }
   0xc   :  { %895 = vsyncadd [#allocation7], 4294966272  ;;  %v695_v0 = vld [vmem:[#allocation6 + $0x38] sm:$0xff]  ;;  %v694_v1 = vld [vmem:[#allocation6 + $0x30] sm:$0xff]  ;;  %s902_s0 = smov [#allocation8]   ;;  %s562_s23 = sshll.u32 %s938_s2, 4  ;;  %s563_s23 = int_to_ptr.hbm [resolvable:$true] %s562_s23 }
   0xd   :  { %304 = vmatpush.bf16.msra.mxu0 %v695_v0  ;;  %791 = vmatpush.bf16.msra.mxu1 %v695_v0  ;;  %v693_v2 = vld [vmem:[#allocation6 + $0x28] sm:$0xff]  ;;  %v692_v3 = vld [vmem:[#allocation6 + $0x20] sm:$0xff]  ;;  %v691_v4 = vld [vmem:[#allocation6 + $0x18] sm:$0xff]  ;;  %s560_s1 = sshll.u32 %s902_s0, 4  ;;  %s561_s1 = int_to_ptr.vmem [resolvable:$true] %s560_s1 }
   0xe   :  { %792 = vmatpush.bf16.msra.mxu2 %v695_v0  ;;  %793 = vmatpush.bf16.msra.mxu3 %v695_v0  ;;  %v690_v5 = vld [vmem:[#allocation6 + $0x10] sm:$0xff]  ;;  %v689_v6 = vld [vmem:[#allocation6 + $0x8] sm:$0xff]  ;;  %v688_v7 = vld [vmem:[#allocation6] sm:$0xff] }
   0xf   :  { %v672_v8 = vld [vmem:[#allocation3] sm:$0xff]  ;;  %v673_v12 = vld [vmem:[#allocation3 + $0x8] sm:$0xff]  ;;  %v674_v16 = vld [vmem:[#allocation3 + $0x10] sm:$0xff] }
  0x10   :  { %v676_v9 = vld [vmem:[#allocation3 + $0x20] sm:$0xff]  ;;  %v677_v13 = vld [vmem:[#allocation3 + $0x28] sm:$0xff]  ;;  %v678_v17 = vld [vmem:[#allocation3 + $0x30] sm:$0xff] }
  0x11   :  { %305 = vmatpush.bf16.msra.mxu0 %v694_v1  ;;  %794 = vmatpush.bf16.msra.mxu1 %v694_v1  ;;  %v680_v10 = vld [vmem:[#allocation3 + $0x40] sm:$0xff]  ;;  %v681_v14 = vld [vmem:[#allocation3 + $0x48] sm:$0xff]  ;;  %v682_v18 = vld [vmem:[#allocation3 + $0x50] sm:$0xff] }
  0x12   :  { %795 = vmatpush.bf16.msra.mxu2 %v694_v1  ;;  %796 = vmatpush.bf16.msra.mxu3 %v694_v1  ;;  %v684_v11 = vld [vmem:[#allocation3 + $0x60] sm:$0xff]  ;;  %v685_v15 = vld [vmem:[#allocation3 + $0x68] sm:$0xff]  ;;  %v686_v19 = vld [vmem:[#allocation3 + $0x70] sm:$0xff] }
  0x13   :  { %v675_v20 = vld [vmem:[#allocation3 + $0x18] sm:$0xff] }
  0x14   :  { %v679_v21 = vld [vmem:[#allocation3 + $0x38] sm:$0xff] }
  0x15   :  { %306 = vmatpush.bf16.msra.mxu0 %v693_v2  ;;  %797 = vmatpush.bf16.msra.mxu1 %v693_v2  ;;  %v683_v22 = vld [vmem:[#allocation3 + $0x58] sm:$0xff] }
  0x16   :  { %798 = vmatpush.bf16.msra.mxu2 %v693_v2  ;;  %799 = vmatpush.bf16.msra.mxu3 %v693_v2  ;;  %v687_v23 = vld [vmem:[#allocation3 + $0x78] sm:$0xff] }
  0x19   :  { %307 = vmatpush.bf16.msra.mxu0 %v692_v3  ;;  %800 = vmatpush.bf16.msra.mxu1 %v692_v3 }
  0x1a   :  { %801 = vmatpush.bf16.msra.mxu2 %v692_v3  ;;  %802 = vmatpush.bf16.msra.mxu3 %v692_v3 }
  0x1d   :  { %308 = vmatpush.bf16.msra.mxu0 %v691_v4  ;;  %803 = vmatpush.bf16.msra.mxu1 %v691_v4 }
  0x1e   :  { %804 = vmatpush.bf16.msra.mxu2 %v691_v4  ;;  %805 = vmatpush.bf16.msra.mxu3 %v691_v4 }
  0x21   :  { %309 = vmatpush.bf16.msra.mxu0 %v690_v5  ;;  %806 = vmatpush.bf16.msra.mxu1 %v690_v5 }
  0x22   :  { %807 = vmatpush.bf16.msra.mxu2 %v690_v5  ;;  %808 = vmatpush.bf16.msra.mxu3 %v690_v5 }
  0x25   :  { %310 = vmatpush.bf16.msra.mxu0 %v689_v6  ;;  %809 = vmatpush.bf16.msra.mxu1 %v689_v6 }
  0x26   :  { %810 = vmatpush.bf16.msra.mxu2 %v689_v6  ;;  %811 = vmatpush.bf16.msra.mxu3 %v689_v6 }
  0x29   :  { %311 = vmatpush.bf16.msra.mxu0 %v688_v7  ;;  %812 = vmatpush.bf16.msra.mxu1 %v688_v7 }
  0x2a   :  { %813 = vmatpush.bf16.msra.mxu2 %v688_v7  ;;  %814 = vmatpush.bf16.msra.mxu3 %v688_v7 }
  0x2c   :  { %312 = vmatmul.bf16.vlgmr.msra.gmra.mxu0 %v672_v8  ;;  %332 = vmatmul.bf16.vlgmr.msra.gmra.mxu1 %v676_v9 }
  0x2d   :  { %352 = vmatmul.bf16.vlgmr.msra.gmra.mxu2 %v680_v10  ;;  %372 = vmatmul.bf16.vlgmr.msra.gmra.mxu3 %v684_v11 }
  0x3c   :  { %317 = vmatmul.bf16.gmra.mxu0 %v673_v12  ;;  %337 = vmatmul.bf16.gmra.mxu1 %v677_v13 }
  0x3d   :  { %357 = vmatmul.bf16.gmra.mxu2 %v681_v14  ;;  %377 = vmatmul.bf16.gmra.mxu3 %v685_v15 }
  0x4c   :  { %322 = vmatmul.bf16.gmra.mxu0 %v674_v16  ;;  %342 = vmatmul.bf16.gmra.mxu1 %v678_v17 }
  0x4d   :  { %362 = vmatmul.bf16.gmra.mxu2 %v682_v18  ;;  %382 = vmatmul.bf16.gmra.mxu3 %v686_v19 }
  0x5c   :  { %327 = vmatmul.bf16.gmra.mxu0 %v675_v20  ;;  %347 = vmatmul.bf16.gmra.mxu1 %v679_v21 }
  0x5d   :  { %367 = vmatmul.bf16.gmra.mxu2 %v683_v22  ;;  %387 = vmatmul.bf16.gmra.mxu3 %v687_v23 }
  0xa9   :  { %v313_v24 = vpop.f32.mrf.mxu0  ;;  %v333_v25 = vpop.f32.mrf.mxu1 }
  0xb0   :  { %v353_v26 = vpop.f32.mrf.mxu2  ;;  %v373_v27 = vpop.f32.mrf.mxu3 }
  0xb1   :  { %v315_v28 = vpop.f32.mrf.mxu0  ;;  %v335_v29 = vpop.f32.mrf.mxu1 }
  0xb2   :  { %v699_v30 = vpack.c.bf16 %v315_v28, %v313_v24  ;;  %v719_v31 = vpack.c.bf16 %v335_v29, %v333_v25 }
  0xb4   :  { %700 = vst [vmem:[#allocation8] sm:$0xff] %v699_v30  }
  0xb5   :  { %779 = vst [vmem:[#allocation8 + $0x20] sm:$0xff] %v719_v31  }
  0xb8   :  { %v355_v32 = vpop.f32.mrf.mxu2  ;;  %v375_v33 = vpop.f32.mrf.mxu3 }
  0xb9   :  { %v739_v34 = vpack.c.bf16 %v355_v32, %v353_v26  ;;  %v759_v35 = vpack.c.bf16 %v375_v33, %v373_v27  ;;  %v318_v36 = vpop.f32.mrf.mxu0  ;;  %v338_v37 = vpop.f32.mrf.mxu1 }
  0xbb   :  { %783 = vst [vmem:[#allocation8 + $0x40] sm:$0xff] %v739_v34  }
  0xbc   :  { %787 = vst [vmem:[#allocation8 + $0x60] sm:$0xff] %v759_v35  }
  0xc0   :  { %v358_v38 = vpop.f32.mrf.mxu2  ;;  %v378_v39 = vpop.f32.mrf.mxu3 }
  0xc1   :  { %v320_v40 = vpop.f32.mrf.mxu0  ;;  %v340_v41 = vpop.f32.mrf.mxu1 }
  0xc2   :  { %v704_v42 = vpack.c.bf16 %v320_v40, %v318_v36  ;;  %v724_v43 = vpack.c.bf16 %v340_v41, %v338_v37 }
  0xc4   :  { %776 = vst [vmem:[#allocation8 + $0x8] sm:$0xff] %v704_v42  }
  0xc5   :  { %780 = vst [vmem:[#allocation8 + $0x28] sm:$0xff] %v724_v43  }
  0xc8   :  { %v360_v44 = vpop.f32.mrf.mxu2  ;;  %v380_v45 = vpop.f32.mrf.mxu3 }
  0xc9   :  { %v744_v46 = vpack.c.bf16 %v360_v44, %v358_v38  ;;  %v764_v47 = vpack.c.bf16 %v380_v45, %v378_v39  ;;  %v323_v48 = vpop.f32.mrf.mxu0  ;;  %v343_v49 = vpop.f32.mrf.mxu1 }
  0xcb   :  { %784 = vst [vmem:[#allocation8 + $0x48] sm:$0xff] %v744_v46  }
  0xcc   :  { %788 = vst [vmem:[#allocation8 + $0x68] sm:$0xff] %v764_v47  }
  0xd0   :  { %v363_v50 = vpop.f32.mrf.mxu2  ;;  %v383_v51 = vpop.f32.mrf.mxu3 }
  0xd1   :  { %v325_v52 = vpop.f32.mrf.mxu0  ;;  %v345_v53 = vpop.f32.mrf.mxu1 }
  0xd2   :  { %v709_v54 = vpack.c.bf16 %v325_v52, %v323_v48  ;;  %v729_v55 = vpack.c.bf16 %v345_v53, %v343_v49 }
  0xd4   :  { %777 = vst [vmem:[#allocation8 + $0x10] sm:$0xff] %v709_v54  }
  0xd5   :  { %781 = vst [vmem:[#allocation8 + $0x30] sm:$0xff] %v729_v55  }
  0xd8   :  { %v365_v56 = vpop.f32.mrf.mxu2  ;;  %v385_v57 = vpop.f32.mrf.mxu3 }
  0xd9   :  { %v749_v58 = vpack.c.bf16 %v365_v56, %v363_v50  ;;  %v769_v59 = vpack.c.bf16 %v385_v57, %v383_v51  ;;  %v328_v60 = vpop.f32.mrf.mxu0  ;;  %v348_v61 = vpop.f32.mrf.mxu1 }
  0xdb   :  { %785 = vst [vmem:[#allocation8 + $0x50] sm:$0xff] %v749_v58  }
  0xdc   :  { %789 = vst [vmem:[#allocation8 + $0x70] sm:$0xff] %v769_v59  }
  0xe0   :  { %v368_v62 = vpop.f32.mrf.mxu2  ;;  %v388_v63 = vpop.f32.mrf.mxu3 }
  0xe1   :  { %v330_v0 = vpop.f32.mrf.mxu0  ;;  %v350_v1 = vpop.f32.mrf.mxu1 }
  0xe2   :  { %v714_v2 = vpack.c.bf16 %v330_v0, %v328_v60  ;;  %v734_v3 = vpack.c.bf16 %v350_v1, %v348_v61 }
  0xe4   :  { %778 = vst [vmem:[#allocation8 + $0x18] sm:$0xff] %v714_v2  }
  0xe5   :  { %782 = vst [vmem:[#allocation8 + $0x38] sm:$0xff] %v734_v3  }
  0xe8   :  { %v370_v4 = vpop.f32.mrf.mxu2  ;;  %v390_v5 = vpop.f32.mrf.mxu3 }
  0xe9   :  { %v754_v6 = vpack.c.bf16 %v370_v4, %v368_v62  ;;  %v774_v7 = vpack.c.bf16 %v390_v5, %v388_v63 }
  0xeb   :  { %786 = vst [vmem:[#allocation8 + $0x58] sm:$0xff] %v754_v6  }
  0xec   :  { %790 = vst [vmem:[#allocation8 + $0x78] sm:$0xff] %v774_v7  }
  0xed   :  { %568 = dma.vmem_to_hbm [thread:$0]  %s561_s1, 2048, %s563_s23, [#allocation5], %s899_s17, %s899_s17, %s900_s18  }
  0xee   :  { %896 = dma.done.wait [#allocation5], 2048  }
  0xef   :  { %897 = vsyncadd [#allocation5], 4294965248 }
  0xf0   :  { %573 = vsyncpa [#allocation4], 1 }
  0xf1   :  { %574 = vsyncpa [#allocation7], 1 }
  0xf2   :  { %575 = vsyncpa [#allocation5], 1 }

</bundles_post_ra>
